<compile_context>
chip_gen: v7x
topology: tpu7x:2x2x1
jax: 0.10.0
libtpu: 0.0.40
codegen_flags: <defaults>
</compile_context>

<pallas_src>
import functools
import math

import jax
import jax.numpy as jnp
import numpy as np
from jax.experimental import pallas as pl
from jax.experimental.pallas import tpu as pltpu


_DEFAULT_VMEM_CAP = 64 * 1024 * 1024  # conservative: v7x per-TC VMEM


def _vmem_budget():
    """(per-block byte budget, vmem_limit_bytes) sized from the device's VMEM."""
    cap = _DEFAULT_VMEM_CAP
    try:
        cap = int(pltpu.get_tpu_info().vmem_capacity_bytes)
    except Exception:
        pass
    # Working set ~= 4 block-sized buffers (2 double-buffered inputs + 2 outs):
    # give each block 1/8 of physical VMEM; leave headroom for the runtime.
    block_budget = max(cap // 8, 512 * 1024)
    vmem_limit = int(cap * 3 // 4)
    return block_budget, vmem_limit


def _largest_divisor(n, limit, multiple=1):
    """Largest b <= limit with n % b == 0 and b % multiple == 0, or None."""
    for b in range(min(n, max(limit, 1)), 0, -1):
        if n % b == 0 and b % multiple == 0:
            return b
    return None


def _fit_block(full_shape, dim, dim_block, itemsize, budget):
    """Per-axis block sizes: `dim` fixed at `dim_block`; every other axis starts
    at full extent and shrinks (outermost first) until the block fits `budget`.
    The lane (last) dim is never shrunk (lane-dense stores); the sublane dim
    only shrinks in multiples of 8 (the (8,128) BlockSpec rule)."""
    ndim = len(full_shape)
    block = list(full_shape)
    block[dim] = dim_block

    def nbytes():
        return math.prod(block) * itemsize

    order = [d for d in range(max(ndim - 2, 0)) if d != dim]
    sub = ndim - 2
    if sub >= 0 and sub != dim:
        order.append(sub)

    for d in order:
        if nbytes() <= budget:
            break
        per_unit = max(nbytes() // block[d], 1)
        target = max(budget // per_unit, 1)
        mult = 8 if d == sub else 1
        b = _largest_divisor(block[d], target, mult)
        if b is None:
            b = _largest_divisor(block[d], mult, mult)
        if b is not None and b < block[d]:
            block[d] = b
    return tuple(block)


def _copy_kernel(x_ref, o_ref):
    # Chunk offset handled entirely by the input BlockSpec -> pure block copy.
    o_ref[...] = x_ref[...]


def _slice_kernel(x_ref, o_ref, *, start, size, dim):
    # Fallback: static slice along `dim` inside the kernel (only used when the
    # sliced dim is a tiled dim and the offset is not tile-expressible).
    sl = tuple(
        slice(start, start + size) if d == dim else slice(None)
        for d in range(len(x_ref.shape))
    )
    o_ref[...] = x_ref[sl]


def chunk_getitem(x, *, chunks, dim, idx, max_block_bytes=None):
    """Pallas equivalent of torch.chunk(x, chunks, dim)[idx]."""
    ndim = x.ndim
    if ndim == 0:
        raise ValueError("chunk expects at least a 1-D tensor")
    dim = dim % ndim
    size = x.shape[dim]
    chunk_size = -(-size // chunks)          # ceil(size / chunks)
    start = idx * chunk_size
    if not (0 <= start < size):
        raise ValueError("chunk index out of range for this configuration")
    out_len = min(chunk_size, size - start)  # last chunk may be shorter

    # Identity fast path: the "chunk" is the whole tensor -> no data movement.
    if start == 0 and out_len == size:
        return x

    out_shape = tuple(out_len if d == dim else s for d, s in enumerate(x.shape))
    itemsize = jnp.dtype(x.dtype).itemsize
    chunk_bytes = math.prod(out_shape) * itemsize

    block_budget, vmem_limit = _vmem_budget()
    if max_block_bytes is not None:
        block_budget = max_block_bytes

    # Largest block size along `dim` expressible with Blocked indexing
    # (offset = block_index * block_size must hit `start` and step by blocks):
    # it must divide both `start` and `out_len`.
    bs = math.gcd(start, out_len) if start else out_len

    # Can the slice be expressed purely in the DMA (BlockSpec)?  Blocks on the
    # last two dims must be (8,128)-divisible or equal the full array extent.
    if dim < ndim - 2:
        dma_slice_ok = True
    elif dim == ndim - 2:
        dma_slice_ok = (bs % 8 == 0)
    else:
        dma_slice_ok = (bs % 128 == 0)

    if dma_slice_ok:
        # Same block shape for input and output (offset lives in the index_map).
        block = _fit_block(out_shape, dim, bs, itemsize, block_budget)
        grid_axes = [(d, out_shape[d] // block[d])
                     for d in range(ndim) if out_shape[d] // block[d] > 1]
        if grid_axes:
            grid = tuple(n for _, n in grid_axes)
            pos = {d: i for i, (d, _) in enumerate(grid_axes)}
        else:
            grid = (1,)
            pos = {}

        dim_block_off = start // bs

        def in_index_map(*g):
            idxs = []
            for d in range(ndim):
                i = g[pos[d]] if d in pos else 0
                if d == dim:
                    i = i + dim_block_off
                idxs.append(i)
            return tuple(idxs)

        def out_index_map(*g):
            return tuple(g[pos[d]] if d in pos else 0 for d in range(ndim))

        return pl.pallas_call(
            _copy_kernel,
            out_shape=jax.ShapeDtypeStruct(out_shape, x.dtype),
            grid=grid,
            in_specs=[pl.BlockSpec(block, in_index_map)],
            out_specs=pl.BlockSpec(block, out_index_map),
            compiler_params=pltpu.CompilerParams(
                dimension_semantics=("parallel",) * len(grid),
                vmem_limit_bytes=vmem_limit),
            cost_estimate=pl.CostEstimate(
                flops=0, transcendentals=0, bytes_accessed=2 * chunk_bytes),
        )(x)

    # ---- Fallback: slice on a tiled dim at a non-tile-expressible offset ----
    # Read the full extent along `dim` per block and slice in-kernel; all other
    # axes are blocked against the VMEM budget and gridded so the copy still
    # pipelines (no whole-tensor residency).
    # TODO(synk): aligned over-fetch (round `start` down to the 8/128 tile
    # boundary) + pltpu.roll would cut read traffic by up to `chunks`x, but
    # needs element-granular BlockSpec offsets along the sliced dim.
    # TODO(synk): lane-dense repacking of narrow last-dim outputs (out_len<128)
    # is skipped; stores are masked for that case.
    kernel = functools.partial(_slice_kernel, start=start, size=out_len, dim=dim)
    in_block = list(_fit_block(x.shape, dim, size, itemsize, block_budget))
    out_block = list(in_block)
    out_block[dim] = out_len

    grid_axes = [(d, x.shape[d] // in_block[d])
                 for d in range(ndim) if d != dim and x.shape[d] // in_block[d] > 1]
    if grid_axes:
        grid = tuple(n for _, n in grid_axes)
        pos = {d: i for i, (d, _) in enumerate(grid_axes)}
    else:
        grid = (1,)
        pos = {}

    def index_map(*g):
        return tuple(g[pos[d]] if d in pos else 0 for d in range(ndim))

    total_bytes = math.prod(x.shape) * itemsize + chunk_bytes
    return pl.pallas_call(
        kernel,
        out_shape=jax.ShapeDtypeStruct(out_shape, x.dtype),
        grid=grid,
        in_specs=[pl.BlockSpec(tuple(in_block), index_map)],
        out_specs=pl.BlockSpec(tuple(out_block), index_map),
        compiler_params=pltpu.CompilerParams(
            dimension_semantics=("parallel",) * len(grid),
            vmem_limit_bytes=vmem_limit),
        cost_estimate=pl.CostEstimate(
            flops=0, transcendentals=0, bytes_accessed=total_bytes),
    )(x)


def _ref_chunk_getitem(x_np, chunks, dim, idx):
    """NumPy reference mirroring torch.chunk semantics."""
    ndim = x_np.ndim
    d = dim % ndim
    size = x_np.shape[d]
    chunk_size = -(-size // chunks)
    start = idx * chunk_size
    stop = min(start + chunk_size, size)
    sl = tuple(slice(start, stop) if a == d else slice(None) for a in range(ndim))
    return x_np[sl]


if __name__ == "__main__":
    key = jax.random.PRNGKey(0)
    k1, k2 = jax.random.split(key)
    x = jax.random.normal(k1, (2, 4, 16, 16), dtype=jnp.float32)
    x2 = jax.random.normal(k2, (2, 11, 16, 16), dtype=jnp.float32)

    configs = [
        # (input, chunks, dim, idx, max_block_bytes)
        (x, 4, 1, 2, None),    # even split on channel dim -> single-block DMA copy
        (x, 2, 1, 1, None),    # 2-channel chunk -> single-block DMA copy
        (x, 2, 2, 1, None),    # sublane dim, 8-aligned offset -> DMA-sliced
        (x, 2, 2, 1, 1024),    # tiny forced budget: exercises multi-axis gridding
        (x2, 3, 1, 2, None),   # ragged last chunk (11 -> 4,4,3): multi-block slice axis
        (x, 3, -1, 2, None),   # uneven split on lane dim (16 -> 6,6,4): fallback path
        (x, 1, 0, 0, None),    # chunks == 1: identity fast path
    ]

    for inp, chunks, dim, idx, mbb in configs:
        out = chunk_getitem(inp, chunks=chunks, dim=dim, idx=idx,
                            max_block_bytes=mbb)
        out = jax.block_until_ready(out)
        ref = _ref_chunk_getitem(np.asarray(inp), chunks, dim, idx)
        assert out.shape == ref.shape, (chunks, dim, idx, out.shape, ref.shape)
        np.testing.assert_array_equal(np.asarray(out), ref)

    print("KERNEL_OK")
</pallas_src>

<mosaic_0001>
module attributes {stable_mosaic.version = 11 : i64} {
  func.func @_copy_kernel(%arg0: i32, %arg1: memref<2x1x16x16xf32, #tpu.memory_space<vmem>>, %arg2: memref<2x1x16x16xf32, #tpu.memory_space<vmem>>) attributes {dimension_semantics = [#tpu.dimension_semantics<parallel>], iteration_bounds = array<i64: 1>, scalar_prefetch = 0 : i64, scratch_operands = 0 : i64, tpu.core_type = #tpu.core_type<tc>, window_params = [{transform_indices = @transform_0, window_bounds = array<i64: 2, 1, 16, 16>}, {pipeline_mode = #tpu.pipeline_mode<synchronous>, transform_indices = @transform_1, window_bounds = array<i64: 2, 1, 16, 16>}]} {
    %c0 = arith.constant 0 : index
    %c0_0 = arith.constant 0 : index
    %c0_1 = arith.constant 0 : index
    %c0_2 = arith.constant 0 : index
    %0 = vector.load %arg1[%c0, %c0_0, %c0_1, %c0_2] : memref<2x1x16x16xf32, #tpu.memory_space<vmem>>, vector<2x1x16x16xf32>
    %c0_3 = arith.constant 0 : index
    %c0_4 = arith.constant 0 : index
    %c0_5 = arith.constant 0 : index
    %c0_6 = arith.constant 0 : index
    %1 = vector.load %arg2[%c0_3, %c0_4, %c0_5, %c0_6] : memref<2x1x16x16xf32, #tpu.memory_space<vmem>>, vector<2x1x16x16xf32>
    tpu.vector_store %arg2[%c0_3, %c0_4, %c0_5, %c0_6], %0 {strides = array<i32>} : memref<2x1x16x16xf32, #tpu.memory_space<vmem>>, vector<2x1x16x16xf32>,
    return
  }
  func.func @transform_0(%arg0: i32) -> (i32, i32, i32, i32) {
    %c0_i32 = arith.constant 0 : i32
    %c2_i32 = arith.constant 2 : i32
    %c0_i32_0 = arith.constant 0 : i32
    %c0_i32_1 = arith.constant 0 : i32
    %c0_i32_2 = arith.constant 0 : i32
    return %c0_i32, %c2_i32, %c0_i32_0, %c0_i32_1 : i32, i32, i32, i32
  }
  func.func @transform_1(%arg0: i32) -> (i32, i32, i32, i32) {
    %c0_i32 = arith.constant 0 : i32
    %c0_i32_0 = arith.constant 0 : i32
    %c0_i32_1 = arith.constant 0 : i32
    %c0_i32_2 = arith.constant 0 : i32
    %c0_i32_3 = arith.constant 0 : i32
    return %c0_i32, %c0_i32_0, %c0_i32_1, %c0_i32_2 : i32, i32, i32, i32
  }
}

</mosaic_0001>

<bundles_post_ra>
// kernel: tpu_custom_call.1
= control target key start
LH: loop header
LB: loop body
LE: loop exit
PB: predicated region body
PF: predicated region fallthrough
CT: control target
= control target key end

     0   :  { %6 = vsyncpa [#allocation3], 0  ;;  %s150_s0 = inlined_call_operand.hbm [shape: f32[2,4,16,16], index: 0, kind: input, shape index: {}]   ;;  %s151_s1 = inlined_call_operand.hbm [shape: f32[2,1,16,16], index: 1, kind: output, shape index: {}]  }
   0x1   :  { %7 = vsyncpa [#allocation4], 0 }
   0x2   :  { %s13_s8 = scalar_lea.hbm %s150_s0, 512  ;;  %s18_s9 = sld [smem:[#allocation0]]  }
   0x3   :  { %s114_s10 = smov [#allocation2]   ;;  %s115_s12 = smov 1024  }
   0x4   :  { %s26_s11 = sshll.u32 %s114_s10, 4  ;;  %33 = sst [smem:[#allocation7]] %s115_s12  ;;  %s27_s11 = int_to_ptr.vmem [resolvable:$true] %s26_s11 }
   0x5   :  { %s116_s13 = smov 256   ;;  %s117_s14 = smov 2  }
   0x6   :  { %35 = sst [smem:[#allocation7 + $0x1]] %s116_s13  ;;  %s118_s16 = smov 128  }
   0x7   :  { %37 = sst [smem:[#allocation7 + $0x2]] %s117_s14  ;;  %s119_s18 = smov 8  }
   0x8   :  { %s75_s15 = sshll.u32 %s18_s9, 26  ;;  %39 = sst [smem:[#allocation7 + $0x3]] %s118_s16 }
   0x9   :  { %s76_s17 = sadd.s32 134217728, %s75_s15  ;;  %41 = sst [smem:[#allocation7 + $0x4]] %s118_s16 }
   0xa   :  { %43 = sst [smem:[#allocation7 + $0x5]] %s119_s18  ;;  %s120_s19 = smov [#allocation3]  }
   0xb   :  { %s121_s20 = smov [#allocation6]  }
   0xc   :  { %45 = dma.general %s13_s8, 512, %s27_s11, %s120_s19, %s121_s20, [#allocation7], %s76_s17, 0  }
   0xd   :  { %110 = dma.done.wait [#allocation3], 512  }
   0xe   :  { %111 = vsyncadd [#allocation3], 4294966784  ;;  %s122_s0 = smov [#allocation5]   ;;  %vm53_vm0 = vcmask 130048   ;;  %v49_v0 = vld [vmem:[#allocation2] sm:$0xff]  ;;  %v50_v1 = vld [vmem:[#allocation2 + $0x8] sm:$0xff] }
   0xf   :  { %s63_s21 = sshll.u32 %s122_s0, 4  ;;  %v51_v2 = vld [vmem:[#allocation2 + $0x10] sm:$0xff]  ;;  %54 = vst.msk [vmem:[#allocation5] sm:$0xff] %vm53_vm0, %v49_v0  ;;  %55 = vst.msk [vmem:[#allocation5 + $0x8] sm:$0xff] %vm53_vm0, %v50_v1  ;;  %v52_v3 = vld [vmem:[#allocation2 + $0x18] sm:$0xff]  ;;  %s64_s21 = int_to_ptr.vmem [resolvable:$true] %s63_s21 }
  0x10   :  { %56 = vst.msk [vmem:[#allocation5 + $0x10] sm:$0xff] %vm53_vm0, %v51_v2  ;;  %57 = vst.msk [vmem:[#allocation5 + $0x18] sm:$0xff] %vm53_vm0, %v52_v3  ;;  %s88_s22 = scalar_lea.vmem %s64_s21, 512  ;;  %p93_p1 = scmp.lt.s32.totalorder %s64_s21, %s64_s21 }
  0x11   :  { %p89_p0 = scmp.ne.s32.totalorder %s64_s21, %s88_s22  ;;  %p94_p2 = scmp.lt.s32.totalorder %s88_s22, %s88_s22 }
  0x13   :  { %p95_p3 = por %p94_p2, %p93_p1 }
  0x15   :  { %p96_p4 = pnand %p95_p3, %p89_p0 }
  0x17   :  { %99 = shalt.err (!%p96_p4)
}
  0x18   :  { %s100_s25 = scalar_lea.hbm %s151_s1, 512 }
  0x19   :  { %p101_p5 = scmp.ne.s32.totalorder %s151_s1, %s100_s25  ;;  %p104_p6 = scmp.lt.u32.totalorder %s100_s25, %s151_s1 }
  0x1b   :  { %p106_p7 = pnand %p104_p6, %p101_p5 }
  0x1d   :  { %109 = shalt.err (!%p106_p7)
}
  0x1e   :  { %s123_s30 = smov 128   ;;  %s124_s2 = smov 8  }
  0x1f   :  { %69 = dma.vmem_to_hbm [thread:$0]  %s64_s21, 512, %s151_s1, [#allocation4], %s123_s30, %s123_s30, %s124_s2  }
  0x20   :  { %112 = dma.done.wait [#allocation4], 512  }
  0x21   :  { %113 = vsyncadd [#allocation4], 4294966784 }
  0x22   :  { %73 = vsyncpa [#allocation3], 1 }
  0x23   :  { %74 = vsyncpa [#allocation4], 1 }

</bundles_post_ra>
